<compile_context>
chip_gen: v7x
topology: tpu7x:2x2x1
jax: 0.10.0
libtpu: 0.0.40
codegen_flags: <defaults>
</compile_context>

<pallas_src>
import functools
import math

import jax
import jax.numpy as jnp
from jax.experimental import pallas as pl
from jax.experimental.pallas import tpu as pltpu


def _round_up(a, b):
    return -(-a // b) * b


def _channel_shuffle_kernel(x_ref, o_ref, *, groups, cg, stripe, unroll_limit):
    """x_ref / o_ref: (n_tile, C, l_tile) with C = groups * cg."""
    g = groups
    C = g * cg

    if g == 1 or cg == 1:
        # Degenerate groupings are the identity permutation -> plain copy.
        o_ref[...] = x_ref[...]
        return

    per_stripe = stripe // g        # strided loads per aligned store
    n_full = C // stripe
    tail = C - n_full * stripe      # leftover output rows (multiple of g)

    def emit_stripe(out_off, base_i, rows):
        # Output channels [out_off, out_off + rows):
        #   for t in [0, rows//g): strided load of input rows
        #   {base_i+t, cg+base_i+t, ..., (g-1)*cg+base_i+t}  ->  g consecutive
        #   output channels, concatenated into one aligned contiguous store.
        nloads = rows // g
        parts = [x_ref[:, pl.ds(base_i + t, g, stride=cg), :]
                 for t in range(nloads)]
        block = parts[0] if nloads == 1 else jnp.concatenate(parts, axis=1)
        o_ref[:, pl.ds(out_off, rows), :] = block

    if n_full <= unroll_limit:
        # Static unroll: static, 8-aligned store offsets.
        for s in range(n_full):
            emit_stripe(s * stripe, s * per_stripe, stripe)
    else:
        # Rolled loop bounds code size / vreg pressure for large C // g.
        @pl.loop(0, n_full)
        def _(s):
            if stripe % 8 == 0:
                off = pl.multiple_of(s * stripe, 8)
            else:
                off = s * stripe
            emit_stripe(off, s * per_stripe, stripe)

    if tail:
        emit_stripe(n_full * stripe, n_full * per_stripe, tail)


def _shuffle_pallas(x, groups, *, target_block_bytes, max_block_bytes,
                    vmem_limit_bytes, vmem_cap_bytes, unroll_limit=64):
    N, C, L = x.shape
    cg = C // groups
    itemsize = jnp.dtype(x.dtype).itemsize
    total_bytes = N * C * L * itemsize

    # ---- lane (L) tiling: full L when it fits, else lane-dense multiple of 128.
    bytes_per_lane_col = C * itemsize
    budget_lanes = max(128, (max_block_bytes // bytes_per_lane_col) // 128 * 128)
    l_tile = L if L <= budget_lanes else budget_lanes

    # ---- batch (N) tiling: fold batch until a block reaches ~target bytes.
    block_bytes_1 = C * l_tile * itemsize
    n_tile = int(max(1, min(N, target_block_bytes // max(1, block_bytes_1))))

    num_n = pl.cdiv(N, n_tile)
    num_l = pl.cdiv(L, l_tile)

    # v7x has 2 TensorCores sharing 3.2 TB/s HBM: give the parallel grid at
    # least 2 steps whenever there is enough data for it to matter.
    if num_n * num_l < 2 and total_bytes >= (1 << 20):
        if N >= 2:
            n_tile = pl.cdiv(N, 2)
            num_n = pl.cdiv(N, n_tile)
        elif L >= 256:
            l_tile = _round_up(pl.cdiv(L, 2), 128)
            num_l = pl.cdiv(L, l_tile)

    block_bytes = n_tile * C * l_tile * itemsize
    # TODO(synk): for C so large that even a (1, C, 128) block overflows the
    # scoped VMEM budget (worst on v7x's 64 MiB), add a channel-split grid
    # axis; here we only raise the scoped limit toward the physical capacity.
    needed = 4 * block_bytes + (2 << 20)      # in+out, double-buffered, + scratch
    cap = max(vmem_limit_bytes, vmem_cap_bytes - (8 << 20))
    vmem_limit = int(min(max(vmem_limit_bytes, needed), cap))

    stripe = min(math.lcm(8, groups), C)

    kernel = functools.partial(
        _channel_shuffle_kernel, groups=groups, cg=cg, stripe=stripe,
        unroll_limit=unroll_limit)

    block = (n_tile, C, l_tile)
    index_map = lambda nb, lb: (nb, 0, lb)

    return pl.pallas_call(
        kernel,
        out_shape=jax.ShapeDtypeStruct((N, C, L), x.dtype),
        grid=(num_n, num_l),
        in_specs=[pl.BlockSpec(block, index_map)],
        out_specs=pl.BlockSpec(block, index_map),
        compiler_params=pltpu.CompilerParams(
            dimension_semantics=("parallel", "parallel"),
            vmem_limit_bytes=vmem_limit,
        ),
        cost_estimate=pl.CostEstimate(
            flops=0, transcendentals=0, bytes_accessed=2 * total_bytes),
    )(x)


def channel_shuffle(x, groups):
    """ChannelShuffle forward: x (N, C, L) -> group-permuted (N, C, L)."""
    N, C, L = x.shape
    assert C % groups == 0, f"Incompatible group size {groups} for channels {C}"

    # Per-generation VMEM / block budgets.
    try:
        vmem_cap = int(pltpu.get_tpu_info().vmem_capacity_bytes)
    except Exception:
        vmem_cap = 64 * 1024 * 1024          # conservative (v7x-sized) default
    vmem_limit = min(vmem_cap // 2, 64 * 1024 * 1024)   # 64 MiB v5e/v6e, 32 MiB v7x
    max_block_bytes = max(1 << 20, vmem_limit // 8)     # ~8 MiB / ~4 MiB
    target_block_bytes = min(4 << 20, max_block_bytes)

    itemsize = jnp.dtype(x.dtype).itemsize
    orig_dtype = x.dtype
    packed = False
    if itemsize in (1, 2) and L > 0 and (L * itemsize) % 4 == 0:
        # Lane-pack sub-32-bit dtypes to uint32 (pure bitcast; the channel
        # permutation is unaffected and the sublane permute stays 32-bit).
        ratio = 4 // itemsize
        x = jax.lax.bitcast_convert_type(
            x.reshape(N, C, L // ratio, ratio), jnp.uint32)
        packed = True

    out = _shuffle_pallas(
        x, groups,
        target_block_bytes=target_block_bytes,
        max_block_bytes=max_block_bytes,
        vmem_limit_bytes=vmem_limit,
        vmem_cap_bytes=vmem_cap)

    if packed:
        out = jax.lax.bitcast_convert_type(out, orig_dtype).reshape(N, C, L)
    return out


if __name__ == "__main__":
    key = jax.random.PRNGKey(0)
    k1, k2, k3 = jax.random.split(key, 3)

    def _ref(x, g):
        n, c, l = x.shape
        return x.reshape(n, g, c // g, l).transpose(0, 2, 1, 3).reshape(n, c, l)

    # Case 1: canonical small config from the spec (N=2, C=4, L=16, groups=2).
    x1 = jax.random.normal(k1, (2, 4, 16), dtype=jnp.float32)
    out1 = jax.block_until_ready(channel_shuffle(x1, groups=2))
    assert out1.shape == x1.shape and out1.dtype == x1.dtype
    assert jnp.array_equal(out1, _ref(x1, 2))

    # Case 2: L not a multiple of 128, groups=4 (exercises stripe assembly).
    x2 = jax.random.normal(k2, (2, 8, 160), dtype=jnp.float32)
    out2 = jax.block_until_ready(channel_shuffle(x2, groups=4))
    assert out2.shape == x2.shape and out2.dtype == x2.dtype
    assert jnp.array_equal(out2, _ref(x2, 4))

    # Case 3: bfloat16 (exercises the uint32 lane-packing path).
    x3 = jax.random.normal(k3, (2, 4, 16), dtype=jnp.bfloat16)
    out3 = jax.block_until_ready(channel_shuffle(x3, groups=2))
    assert out3.shape == x3.shape and out3.dtype == x3.dtype
    assert jnp.array_equal(out3, _ref(x3, 2))

    print("KERNEL_OK")
</pallas_src>

<mosaic_0001>
module attributes {stable_mosaic.version = 11 : i64} {
  func.func @_channel_shuffle_kernel(%arg0: i32, %arg1: i32, %arg2: memref<2x4x16xf32, #tpu.memory_space<vmem>>, %arg3: memref<2x4x16xf32, #tpu.memory_space<vmem>>) attributes {dimension_semantics = [#tpu.dimension_semantics<parallel>, #tpu.dimension_semantics<parallel>], iteration_bounds = array<i64: 1, 1>, scalar_prefetch = 0 : i64, scratch_operands = 0 : i64, tpu.core_type = #tpu.core_type<tc>, window_params = [{transform_indices = @transform_0, window_bounds = array<i64: 2, 4, 16>}, {transform_indices = @transform_1, window_bounds = array<i64: 2, 4, 16>}]} {
    %c0 = arith.constant 0 : index
    %c0_0 = arith.constant 0 : index
    %c0_1 = arith.constant 0 : index
    %0 = tpu.strided_load %arg2[%c0, %c0_0, %c0_1] {strides = array<i32: 1, 2, 1>} : memref<2x4x16xf32, #tpu.memory_space<vmem>>, vector<2x2x16xf32>
    %c0_2 = arith.constant 0 : index
    %c1 = arith.constant 1 : index
    %c0_3 = arith.constant 0 : index
    %1 = tpu.strided_load %arg2[%c0_2, %c1, %c0_3] {strides = array<i32: 1, 2, 1>} : memref<2x4x16xf32, #tpu.memory_space<vmem>>, vector<2x2x16xf32>
    %2 = tpu.concatenate %0, %1 in 1 : vector<2x2x16xf32>, vector<2x2x16xf32> -> vector<2x4x16xf32>
    %c0_4 = arith.constant 0 : index
    %c0_5 = arith.constant 0 : index
    %c0_6 = arith.constant 0 : index
    %3 = vector.load %arg3[%c0_4, %c0_5, %c0_6] : memref<2x4x16xf32, #tpu.memory_space<vmem>>, vector<2x4x16xf32>
    tpu.vector_store %arg3[%c0_4, %c0_5, %c0_6], %2 {strides = array<i32>} : memref<2x4x16xf32, #tpu.memory_space<vmem>>, vector<2x4x16xf32>,
    return
  }
  func.func @transform_0(%arg0: i32, %arg1: i32) -> (i32, i32, i32) {
    %c0_i32 = arith.constant 0 : i32
    %c0_i32_0 = arith.constant 0 : i32
    return %arg0, %c0_i32, %arg1 : i32, i32, i32
  }
  func.func @transform_1(%arg0: i32, %arg1: i32) -> (i32, i32, i32) {
    %c0_i32 = arith.constant 0 : i32
    %c0_i32_0 = arith.constant 0 : i32
    return %arg0, %c0_i32, %arg1 : i32, i32, i32
  }
}

</mosaic_0001>

<bundles_post_ra>
// kernel: tpu_custom_call.1
= control target key start
LH: loop header
LB: loop body
LE: loop exit
PB: predicated region body
PF: predicated region fallthrough
CT: control target
= control target key end

     0   :  { %6 = vsyncpa [#allocation3], 0  ;;  %s155_s0 = inlined_call_operand.hbm [shape: f32[2,4,16], index: 0, kind: input, shape index: {}]   ;;  %s156_s1 = inlined_call_operand.hbm [shape: f32[2,4,16], index: 1, kind: output, shape index: {}]  }
   0x1   :  { %7 = vsyncpa [#allocation4], 0  ;;  %s111_s6 = smov [#allocation2]   ;;  %s63_s10 = scalar_lea.hbm %s155_s0, 128 }
   0x2   :  { %s13_s7 = sshll.u32 %s111_s6, 4  ;;  %p64_p0 = scmp.ne.s32.totalorder %s155_s0, %s63_s10  ;;  %s14_s7 = int_to_ptr.vmem [resolvable:$true] %s13_s7 }
   0x3   :  { %p67_p1 = scmp.lt.u32.totalorder %s63_s10, %s155_s0 }
   0x5   :  { %p69_p2 = pnand %p67_p1, %p64_p0 }
   0x7   :  { %72 = shalt.err (!%p69_p2)
}
   0x8   :  { %s73_s15 = scalar_lea.vmem %s14_s7, 128  ;;  %p78_p4 = scmp.lt.s32.totalorder %s14_s7, %s14_s7 }
   0x9   :  { %p74_p3 = scmp.ne.s32.totalorder %s14_s7, %s73_s15  ;;  %p79_p5 = scmp.lt.s32.totalorder %s73_s15, %s73_s15 }
   0xb   :  { %p80_p6 = por %p79_p5, %p78_p4 }
   0xd   :  { %p81_p7 = pnand %p80_p6, %p74_p3 }
   0xf   :  { %84 = shalt.err (!%p81_p7)
}
  0x10   :  { %s112_s16 = smov 64   ;;  %s113_s17 = smov 4  }
  0x11   :  { %19 = dma.hbm_to_vmem [thread:$0]  %s155_s0, 128, %s14_s7, [#allocation3], %s112_s16, %s112_s16, %s113_s17  }
  0x12   :  { %107 = dma.done.wait [#allocation3], 128  }
  0x13   :  { %108 = vsyncadd [#allocation3], 4294967168  ;;  %vm36_vm0 = vcmask 1041408   ;;  %v23_v0 = vld [vmem:[#allocation2] ss:$2 sm:$0x3] }
  0x14   :  { %v27_v1 = vld [vmem:[#allocation2 + $0x1] ss:$2 sm:$0x3]  ;;  %vm39_vm1 = vcmask 125952   ;;  %s114_s20 = smov [#allocation5]  }
  0x15   :  { %v32_v2 = vrot.slane %v27_v1, 6  ;;  %s47_s21 = sshll.u32 %s114_s20, 4  ;;  %v25_v3 = vld [vmem:[#allocation2 + $0x4] ss:$2 sm:$0x3]  ;;  %s48_s21 = int_to_ptr.vmem [resolvable:$true] %s47_s21 }
  0x16   :  { %v29_v4 = vld [vmem:[#allocation2 + $0x5] ss:$2 sm:$0x3]  ;;  %s85_s22 = scalar_lea.vmem %s48_s21, 128  ;;  %p90_p9 = scmp.lt.s32.totalorder %s48_s21, %s48_s21 }
  0x17   :  { %v37_v5 = vsel %vm36_vm0, %v23_v0, %v32_v2  ;;  %v33_v6 = vrot.slane %v29_v4, 6  ;;  %p86_p8 = scmp.ne.s32.totalorder %s48_s21, %s85_s22  ;;  %p91_p10 = scmp.lt.s32.totalorder %s85_s22, %s85_s22 }
  0x18   :  { %40 = vst.msk [vmem:[#allocation5] sm:$0xf] %vm39_vm1, %v37_v5 }
  0x19   :  { %v38_v7 = vsel %vm36_vm0, %v25_v3, %v33_v6  ;;  %p92_p11 = por %p91_p10, %p90_p9 }
  0x1a   :  { %41 = vst.msk [vmem:[#allocation5 + $0x4] sm:$0xf] %vm39_vm1, %v38_v7 }
  0x1b   :  { %p93_p12 = pnand %p92_p11, %p86_p8 }
  0x1d   :  { %96 = shalt.err (!%p93_p12)
}
  0x1e   :  { %s97_s24 = scalar_lea.hbm %s156_s1, 128 }
  0x1f   :  { %p98_p13 = scmp.ne.s32.totalorder %s156_s1, %s97_s24  ;;  %p101_p0 = scmp.lt.u32.totalorder %s97_s24, %s156_s1 }
  0x21   :  { %p103_p1 = pnand %p101_p0, %p98_p13 }
  0x23   :  { %106 = shalt.err (!%p103_p1)
}
  0x24   :  { %53 = dma.vmem_to_hbm [thread:$0]  %s48_s21, 128, %s156_s1, [#allocation4], %s112_s16, %s112_s16, %s113_s17  }
  0x25   :  { %109 = dma.done.wait [#allocation4], 128  }
  0x26   :  { %110 = vsyncadd [#allocation4], 4294967168 }
  0x27   :  { %57 = vsyncpa [#allocation3], 1 }
  0x28   :  { %58 = vsyncpa [#allocation4], 1 }

</bundles_post_ra>
